<compile_context>
chip_gen: v6e
topology: v6e:2x2x1
jax: 0.10.0
libtpu: 0.0.40
codegen_flags: <defaults>
</compile_context>

<pallas_src>
import functools

import jax
import jax.numpy as jnp
from jax.experimental import pallas as pl
from jax.experimental.pallas import tpu as pltpu

NEG_SLOPE = 0.01  # torch.nn.LeakyReLU default negative_slope


def _round_up(v, m):
    return ((v + m - 1) // m) * m


def _linear_layers_kernel(seed_ref, *refs, use_bias, has_batch, dropout_p,
                          train, e_pad):
    """Fused (scale) -> matmul(s) -> (+bias) -> LeakyReLU -> dropout.

    seed_ref : SMEM scalar-prefetch int32[1]  (dropout seed)
    refs     : x, [batch], w_x, [w_batch], bias | reg_x, [reg_batch], out
    """
    refs = list(refs)
    o_ref = refs.pop()                       # output ref is last
    it = iter(refs)
    x_ref = next(it)
    b_ref = next(it) if has_batch else None
    wx_ref = next(it)
    wb_ref = next(it) if has_batch else None
    if use_bias:
        bias_ref = next(it)
        rx_ref = rb_ref = None
    else:
        bias_ref = None
        rx_ref = next(it)
        rb_ref = next(it) if has_batch else None

    # --- matmul: bf16 operands, f32 accumulation on the MXU -----------------
    x = x_ref[...].astype(jnp.float32)
    if not use_bias:
        x = x * rx_ref[...]                  # regularization (f32)
    y = jnp.dot(x.astype(jnp.bfloat16), wx_ref[...],
                preferred_element_type=jnp.float32)
    if has_batch:
        b = b_ref[...].astype(jnp.float32)
        if not use_bias:
            b = b * rb_ref[...]
        y = y + jnp.dot(b.astype(jnp.bfloat16), wb_ref[...],
                        preferred_element_type=jnp.float32)
    if use_bias:
        y = y + bias_ref[...]

    # --- LeakyReLU (f32 elementwise tail) -----------------------------------
    y = jnp.where(y >= 0.0, y, jnp.float32(NEG_SLOPE) * y)

    # --- Dropout (train mode): counter-hash PRNG, integer compare only ------
    # TODO(synk): cannot bit-match torch's RNG stream; semantics (keep-prob
    # 1-p, scale 1/(1-p)) are reproduced with a tile-invariant hash PRNG.
    if train and dropout_p > 0.0:
        tm, tn = y.shape
        rows = (jax.lax.broadcasted_iota(jnp.int32, (tm, tn), 0)
                + pl.program_id(0) * tm)
        cols = (jax.lax.broadcasted_iota(jnp.int32, (tm, tn), 1)
                + pl.program_id(1) * tn)
        idx = (rows * e_pad + cols).astype(jnp.uint32)
        seed_u = seed_ref[0].astype(jnp.uint32)
        u = idx + seed_u * jnp.uint32(0x9E3779B9)
        # lowbias32 finalizer
        u = (u ^ (u >> 16)) * jnp.uint32(0x7FEB352D)
        u = (u ^ (u >> 15)) * jnp.uint32(0x846CA68B)
        u = u ^ (u >> 16)
        thresh24 = int(float(dropout_p) * float(1 << 24))
        keep = (u >> 8).astype(jnp.int32) >= thresh24   # P(keep) = 1 - p
        inv_keep = jnp.float32(1.0 / (1.0 - float(dropout_p)))
        y = jnp.where(keep, y * inv_keep, 0.0)

    o_ref[...] = y.astype(o_ref.dtype)


def linear_layers_forward(x, batch, weight, bias_or_reg, *,
                          use_bias=True, dropout_p=0.1, train=True, seed=0):
    """x: (N, start), batch: (N, num_batch) or None, weight: (end, start+num_batch).

    bias_or_reg: bias (end,) if use_bias else regularization (start+num_batch,).
    """
    N, start_dim = x.shape
    has_batch = batch is not None and batch.shape[1] != 0
    nb = batch.shape[1] if has_batch else 0
    E = weight.shape[0]
    K = start_dim + nb
    assert weight.shape[1] == K

    # Lane-dense output: pad E up to a multiple of 128; tn=256 if it divides.
    E_pad = _round_up(E, 128)
    tn = 256 if (E_pad % 256 == 0) else 128
    tm = min(512, _round_up(N, 8))
    grid = (pl.cdiv(N, tm), E_pad // tn)

    # Weight prep (split along input dim -> no activation concat needed).
    # NOTE: in a real model, pre-transpose / pre-split / pre-cast the weight
    # once outside the hot path instead of per call.
    w = jnp.asarray(weight, jnp.float32)
    if E_pad != E:
        w = jnp.pad(w, ((0, E_pad - E), (0, 0)))
    w_t = w.T.astype(jnp.bfloat16)                        # (K, E_pad) bf16
    wx_t = w_t[:start_dim]                                # (start, E_pad)
    wb_t = w_t[start_dim:] if has_batch else None         # (nb, E_pad)

    inputs = [jnp.asarray(x, jnp.float32)]
    in_specs = [pl.BlockSpec((tm, start_dim), lambda i, j, s: (i, 0))]
    if has_batch:
        inputs.append(jnp.asarray(batch, jnp.float32))
        in_specs.append(pl.BlockSpec((tm, nb), lambda i, j, s: (i, 0)))
    inputs.append(wx_t)
    in_specs.append(pl.BlockSpec((start_dim, tn), lambda i, j, s: (0, j)))
    if has_batch:
        inputs.append(wb_t)
        in_specs.append(pl.BlockSpec((nb, tn), lambda i, j, s: (0, j)))
    if use_bias:
        bias = jnp.asarray(bias_or_reg, jnp.float32).reshape(1, E)
        if E_pad != E:
            bias = jnp.pad(bias, ((0, 0), (0, E_pad - E)))
        inputs.append(bias)
        in_specs.append(pl.BlockSpec((1, tn), lambda i, j, s: (0, j)))
    else:
        reg = jnp.asarray(bias_or_reg, jnp.float32).reshape(1, K)
        inputs.append(reg[:, :start_dim])
        in_specs.append(pl.BlockSpec((1, start_dim), lambda i, j, s: (0, 0)))
        if has_batch:
            inputs.append(reg[:, start_dim:])
            in_specs.append(pl.BlockSpec((1, nb), lambda i, j, s: (0, 0)))

    out_spec = pl.BlockSpec((tm, tn), lambda i, j, s: (i, j))
    seed_arr = jnp.array([int(seed)], dtype=jnp.int32)

    kernel = functools.partial(_linear_layers_kernel,
                               use_bias=bool(use_bias),
                               has_batch=bool(has_batch),
                               dropout_p=float(dropout_p),
                               train=bool(train),
                               e_pad=int(E_pad))

    # VMEM budget: double-buffered blocks + headroom (kept within v7x 64 MiB).
    blk_bytes = (tm * start_dim * 4 + tm * nb * 4
                 + start_dim * tn * 2 + nb * tn * 2
                 + tn * 4 + tm * tn * 4)
    vmem_limit = int(min(64 << 20, max(32 << 20, 4 * blk_bytes)))

    cost = pl.CostEstimate(
        flops=2 * N * K * E_pad + 6 * N * E_pad,
        transcendentals=0,
        bytes_accessed=4 * N * K + 2 * K * E_pad + 4 * E_pad + 4 * N * E_pad,
    )

    out = pl.pallas_call(
        kernel,
        out_shape=jax.ShapeDtypeStruct((N, E_pad), jnp.float32),
        grid_spec=pltpu.PrefetchScalarGridSpec(
            num_scalar_prefetch=1,
            grid=grid,
            in_specs=in_specs,
            out_specs=out_spec,
        ),
        compiler_params=pltpu.CompilerParams(
            dimension_semantics=("parallel", "parallel"),
            vmem_limit_bytes=vmem_limit,
        ),
        cost_estimate=cost,
    )(seed_arr, *inputs)

    return out[:, :E] if E_pad != E else out


# ----------------------------- references ----------------------------------
def _round_bf16(a):
    return a.astype(jnp.bfloat16).astype(jnp.float32)


def _reference_eval(x, batch, weight, bias):
    """Eval-mode forward, bias=True path (dropout = identity), bf16 matmul."""
    xin = jnp.concatenate([x, batch], axis=1)
    y = _round_bf16(xin) @ _round_bf16(weight).T + bias
    return jnp.where(y >= 0.0, y, NEG_SLOPE * y)


def _reference_eval_nobias(x, batch, weight, reg):
    """Eval-mode forward, bias=False (regularization) path."""
    xin = jnp.concatenate([x, batch], axis=1) * reg.reshape(1, -1)
    y = _round_bf16(xin) @ _round_bf16(weight).T
    return jnp.where(y >= 0.0, y, NEG_SLOPE * y)


if __name__ == "__main__":
    # Module hyper-params (small): start=32, num_batch=4, end=32, N=8
    start, num_batch, end, N = 32, 4, 32, 8
    K = start + num_batch

    key = jax.random.PRNGKey(0)
    kx, kb, kw, kbias, kreg = jax.random.split(key, 5)

    x = jax.random.normal(kx, (N, start), dtype=jnp.float32)
    batch = jax.random.normal(kb, (N, num_batch), dtype=jnp.float32)

    # torch.nn.Linear-style uniform(-1/sqrt(fan_in), 1/sqrt(fan_in)) init.
    bound = 1.0 / (K ** 0.5)
    weight = jax.random.uniform(kw, (end, K), jnp.float32, -bound, bound)
    bias = jax.random.uniform(kbias, (end,), jnp.float32, -bound, bound)
    reg = jax.random.uniform(kreg, (K,), jnp.float32, 0.5, 1.5)

    # 1) Eval mode, bias=True path.
    out_eval = linear_layers_forward(x, batch, weight, bias,
                                     use_bias=True, dropout_p=0.1,
                                     train=False)
    out_eval = jax.block_until_ready(out_eval)
    ref = _reference_eval(x, batch, weight, bias)
    assert out_eval.shape == (N, end)
    assert jnp.allclose(out_eval, ref, atol=1e-4, rtol=1e-4), "bias path mismatch"

    # 2) Eval mode, bias=False (regularization) path.
    out_reg = linear_layers_forward(x, batch, weight, reg,
                                    use_bias=False, dropout_p=0.1,
                                    train=False)
    out_reg = jax.block_until_ready(out_reg)
    ref_reg = _reference_eval_nobias(x, batch, weight, reg)
    assert out_reg.shape == (N, end)
    assert jnp.allclose(out_reg, ref_reg, atol=1e-4, rtol=1e-4), "reg path mismatch"

    # 3) Train mode (exercises in-kernel hash-PRNG dropout).
    p = 0.1
    out_train = linear_layers_forward(x, batch, weight, bias,
                                      use_bias=True, dropout_p=p,
                                      train=True, seed=42)
    out_train = jax.block_until_ready(out_train)
    assert out_train.shape == (N, end)
    assert bool(jnp.all(jnp.isfinite(out_train)))
    zero_frac = float(jnp.mean(out_train == 0.0))
    assert 0.0 < zero_frac < 0.35, f"unexpected dropout zero fraction {zero_frac}"
    nz = out_train != 0.0
    assert jnp.allclose(jnp.where(nz, out_train, 0.0),
                        jnp.where(nz, out_eval / (1.0 - p), 0.0),
                        atol=1e-4, rtol=1e-4), "kept elements not scaled by 1/(1-p)"

    print("KERNEL_OK")
</pallas_src>

<mosaic_0001>
module attributes {stable_mosaic.version = 11 : i64} {
  func.func @_linear_layers_kernel(%arg0: i32, %arg1: i32, %arg2: memref<1xi32, #tpu.memory_space<smem>>, %arg3: memref<8x32xf32, #tpu.memory_space<vmem>>, %arg4: memref<8x4xf32, #tpu.memory_space<vmem>>, %arg5: memref<32x128xbf16, #tpu.memory_space<vmem>>, %arg6: memref<4x128xbf16, #tpu.memory_space<vmem>>, %arg7: memref<1x128xf32, #tpu.memory_space<vmem>>, %arg8: memref<8x128xf32, #tpu.memory_space<vmem>>) attributes {dimension_semantics = [#tpu.dimension_semantics<parallel>, #tpu.dimension_semantics<parallel>], iteration_bounds = array<i64: 1, 1>, scalar_prefetch = 1 : i64, scratch_operands = 0 : i64, tpu.core_type = #tpu.core_type<tc>, window_params = [{transform_indices = @transform_0, window_bounds = array<i64: 8, 32>}, {transform_indices = @transform_1, window_bounds = array<i64: 8, 4>}, {transform_indices = @transform_2, window_bounds = array<i64: 32, 128>}, {transform_indices = @transform_3, window_bounds = array<i64: 4, 128>}, {transform_indices = @transform_4, window_bounds = array<i64: 1, 128>}, {transform_indices = @transform_5, window_bounds = array<i64: 8, 128>}]} {
    %c0 = arith.constant 0 : index
    %c0_0 = arith.constant 0 : index
    %0 = vector.load %arg3[%c0, %c0_0] : memref<8x32xf32, #tpu.memory_space<vmem>>, vector<8x32xf32>
    %1 = arith.truncf %0 : vector<8x32xf32> to vector<8x32xbf16>
    %c0_1 = arith.constant 0 : index
    %c0_2 = arith.constant 0 : index
    %2 = vector.load %arg5[%c0_1, %c0_2] : memref<32x128xbf16, #tpu.memory_space<vmem>>, vector<32x128xbf16>
    %cst = arith.constant dense<0.000000e+00> : vector<8x128xf32>
    %3 = tpu.matmul %1, %2, %cst {dimension_numbers = #tpu.dot_dimension_numbers<[1], [0], [0], [1], [0, 0, 1, 1], [], []>} : vector<8x32xbf16>, vector<32x128xbf16>, vector<8x128xf32> -> vector<8x128xf32>
    %c0_3 = arith.constant 0 : index
    %c0_4 = arith.constant 0 : index
    %4 = vector.load %arg4[%c0_3, %c0_4] : memref<8x4xf32, #tpu.memory_space<vmem>>, vector<8x4xf32>
    %5 = arith.truncf %4 : vector<8x4xf32> to vector<8x4xbf16>
    %c0_5 = arith.constant 0 : index
    %c0_6 = arith.constant 0 : index
    %6 = vector.load %arg6[%c0_5, %c0_6] : memref<4x128xbf16, #tpu.memory_space<vmem>>, vector<4x128xbf16>
    %cst_7 = arith.constant dense<0.000000e+00> : vector<8x128xf32>
    %7 = tpu.matmul %5, %6, %cst_7 {dimension_numbers = #tpu.dot_dimension_numbers<[1], [0], [0], [1], [0, 0, 1, 1], [], []>} : vector<8x4xbf16>, vector<4x128xbf16>, vector<8x128xf32> -> vector<8x128xf32>
    %8 = arith.addf %3, %7 : vector<8x128xf32>
    %c0_8 = arith.constant 0 : index
    %c0_9 = arith.constant 0 : index
    %9 = vector.load %arg7[%c0_8, %c0_9] : memref<1x128xf32, #tpu.memory_space<vmem>>, vector<1x128xf32>
    %10 = vector.broadcast %9 : vector<1x128xf32> to vector<8x128xf32>
    %11 = arith.addf %8, %10 : vector<8x128xf32>
    %cst_10 = arith.constant 0.000000e+00 : f32
    %12 = vector.broadcast %cst_10 : f32 to vector<8x128xf32>
    %13 = arith.cmpf oge, %11, %12 : vector<8x128xf32>
    %cst_11 = arith.constant 0.00999999977 : f32
    %14 = vector.broadcast %cst_11 : f32 to vector<8x128xf32>
    %15 = arith.mulf %14, %11 : vector<8x128xf32>
    %16 = arith.select %13, %11, %15 : vector<8x128xi1>, vector<8x128xf32>
    %c0_12 = arith.constant 0 : index
    %c0_13 = arith.constant 0 : index
    %17 = vector.load %arg8[%c0_12, %c0_13] : memref<8x128xf32, #tpu.memory_space<vmem>>, vector<8x128xf32>
    tpu.vector_store %arg8[%c0_12, %c0_13], %16 {strides = array<i32>} : memref<8x128xf32, #tpu.memory_space<vmem>>, vector<8x128xf32>,
    return
  }
  func.func @transform_0(%arg0: i32, %arg1: i32, %arg2: memref<1xi32, #tpu.memory_space<smem>>) -> (i32, i32) {
    %c0_i32 = arith.constant 0 : i32
    %c0_i32_0 = arith.constant 0 : i32
    return %arg0, %c0_i32 : i32, i32
  }
  func.func @transform_1(%arg0: i32, %arg1: i32, %arg2: memref<1xi32, #tpu.memory_space<smem>>) -> (i32, i32) {
    %c0_i32 = arith.constant 0 : i32
    %c0_i32_0 = arith.constant 0 : i32
    return %arg0, %c0_i32 : i32, i32
  }
  func.func @transform_2(%arg0: i32, %arg1: i32, %arg2: memref<1xi32, #tpu.memory_space<smem>>) -> (i32, i32) {
    %c0_i32 = arith.constant 0 : i32
    %c0_i32_0 = arith.constant 0 : i32
    return %c0_i32, %arg1 : i32, i32
  }
  func.func @transform_3(%arg0: i32, %arg1: i32, %arg2: memref<1xi32, #tpu.memory_space<smem>>) -> (i32, i32) {
    %c0_i32 = arith.constant 0 : i32
    %c0_i32_0 = arith.constant 0 : i32
    return %c0_i32, %arg1 : i32, i32
  }
  func.func @transform_4(%arg0: i32, %arg1: i32, %arg2: memref<1xi32, #tpu.memory_space<smem>>) -> (i32, i32) {
    %c0_i32 = arith.constant 0 : i32
    %c0_i32_0 = arith.constant 0 : i32
    return %c0_i32, %arg1 : i32, i32
  }
  func.func @transform_5(%arg0: i32, %arg1: i32, %arg2: memref<1xi32, #tpu.memory_space<smem>>) -> (i32, i32) {
    %c0_i32 = arith.constant 0 : i32
    return %arg0, %arg1 : i32, i32
  }
}

</mosaic_0001>

<bundles_post_ra>
// kernel: tpu_custom_call.1
= control target key start
LH: loop header
LB: loop body
LE: loop exit
PB: predicated region body
PF: predicated region fallthrough
CT: control target
= control target key end

     0   :  { %12 = vsyncpa [#allocation5], 0  ;;  %s310_s0 = inlined_call_operand.<no memory space> [shape: s32[1], index: 0, kind: input, shape index: {}]   ;;  %s311_s1 = inlined_call_operand.hbm [shape: f32[8,32], index: 1, kind: input, shape index: {}]   ;;  %s312_s2 = inlined_call_operand.vmem [shape: f32[8,4], index: 2, kind: input, shape index: {}]   ;;  %s313_s3 = inlined_call_operand.vmem [shape: bf16[32,128], index: 3, kind: input, shape index: {}]   ;;  %s314_s4 = inlined_call_operand.vmem [shape: bf16[4,128], index: 4, kind: input, shape index: {}]   ;;  %s315_s5 = inlined_call_operand.vmem [shape: f32[1,128], index: 5, kind: input, shape index: {}]   ;;  %s316_s6 = inlined_call_operand.hbm [shape: f32[8,128], index: 6, kind: output, shape index: {}]  }
   0x1   :  { %13 = vsyncpa [#allocation6], 0  ;;  %s250_s0 = smov [#allocation4]  }
   0x2   :  { %s20_s21 = sshll.u32 %s250_s0, 4  ;;  %s21_s21 = int_to_ptr.vmem [resolvable:$true] %s20_s21 }
   0x3   :  { %s214_s22 = scalar_lea.vmem %s21_s21, 128  ;;  %p219_p1 = scmp.lt.s32.totalorder %s21_s21, %s21_s21 }
   0x4   :  { %p215_p0 = scmp.ne.s32.totalorder %s21_s21, %s214_s22  ;;  %p220_p2 = scmp.lt.s32.totalorder %s214_s22, %s214_s22 }
   0x6   :  { %p221_p3 = por %p220_p2, %p219_p1 }
   0x8   :  { %p222_p4 = pnand %p221_p3, %p215_p0 }
   0xa   :  { %225 = shalt.err (!%p222_p4)
}
   0xb   :  { %23 = dma.hbm_to_vmem [thread:$0]  %s311_s1, 128, %s21_s21, [#allocation5]  }
   0xc   :  { %246 = dma.done.wait [#allocation5], 128  }
   0xd   :  { %247 = vsyncadd [#allocation5], 4294967168  ;;  %v251_v0 = vmov 0.0   ;;  %vm252_vm0 = vmmov 0   ;;  %vm49_vm1 = vcmask 1041408   ;;  %v204_v3 = vld [vmem:[%s313_s3 + $0x8] sm:$0xff]  }
   0xe   :  { %186 = vmatprep.subr.bf16.mxu0 %v251_v0  ;;  %192 = vmatprep.subr.bf16.mxu1 %v251_v0  ;;  %v44_v1 = vld [vmem:[%s314_s4] sm:$0x3]  ;;  %vm45_vm2 = vcmask 31744   ;;  %vm105_vm3 = vcmask 261120  }
   0xf   :  { %188 = vmatprep.mubr.msk.bf16.mxu0 %vm252_vm0, %v251_v0  ;;  %196 = vmatprep.mubr.msk.bf16.mxu1 %vm252_vm0, %v251_v0  ;;  %v51_v2 = vsel %vm49_vm1, %v44_v1, 0  ;;  %v42_v4 = vld [vmem:[%s312_s2] sm:$0xff] }
  0x10   :  { %187 = vmatpush3.bf16.msra.mxu0 %v51_v2  ;;  %v43_v5 = vpack.c.bf16 %v42_v4, %v42_v4  ;;  %193 = vmatpush3.bf16.msra.mxu1 %v204_v3  ;;  %v205_v6 = vld [vmem:[%s313_s3] sm:$0xff]   ;;  %s253_s3 = smov [#allocation7]  }
  0x11   :  { %v36_v7 = vld [vmem:[#allocation4] sm:$0xff]  ;;  %194 = vmatprep.subr.bf16.mxu1 %v251_v0  ;;  %s167_s8 = sshll.u32 %s253_s3, 4  ;;  %s168_s8 = int_to_ptr.vmem [resolvable:$true] %s167_s8 }
  0x12   :  { %v37_v8 = vpack.c.bf16 %v36_v7, %v36_v7  ;;  %v180_v13 = vld [vmem:[%s315_s5] ss:$0 sm:$0xff]  ;;  %s226_s9 = scalar_lea.vmem %s168_s8, 128  ;;  %p231_p6 = scmp.lt.s32.totalorder %s168_s8, %s168_s8 }
  0x13   :  { %189 = vmatmul.mubr.msk.bf16.vlgmr.msra.gmra.mxu0 %vm45_vm2, %v43_v5  ;;  %p227_p5 = scmp.ne.s32.totalorder %s168_s8, %s226_s9  ;;  %p232_p7 = scmp.lt.s32.totalorder %s226_s9, %s226_s9 }
  0x14   :  { %195 = vmatpush3.bf16.msra.mxu1 %v205_v6 }
  0x15   :  { %p233_p8 = por %p232_p7, %p231_p6 }
  0x17   :  { %197 = vmatmul.mubr.msk.bf16.vlgmr.msra.gmra.mxu1 %vm105_vm3, %v37_v8  ;;  %p234_p9 = pnand %p233_p8, %p227_p5 }
  0xd3   :  { %v87_v9 = vpop.f32.mrf.mxu0 }
  0xd5   :  { %v190_v10 = vpop.f32.mrf.mxu0 }
  0xd7   :  { %v90_v11 = vpop.f32.mrf.mxu0  ;;  %v143_v12 = vpop.f32.mrf.mxu1 }
  0xd8   :  { %v144_v14 = vadd.f32 %v143_v12, %v87_v9 }
  0xd9   :  { %v191_v15 = vpop.f32.mrf.mxu0  ;;  %v198_v16 = vpop.f32.mrf.mxu1 }
  0xda   :  { %v156_v17 = vadd.f32 %v180_v13, %v144_v14 }
  0xdb   :  { %v146_v18 = vpop.f32.mrf.mxu1 }
  0xdc   :  { %v158_v19 = vmul.f32 0.01, %v156_v17  ;;  %vm157_vm4 = vcmp.ge.f32.partialorder %v156_v17, 0.0 }
  0xdd   :  { %v199_v20 = vpop.f32.mrf.mxu1 }
  0xde   :  { %v159_v21 = vsel %vm157_vm4, %v156_v17, %v158_v19 }
  0xdf   :  { %160 = vst [vmem:[#allocation7] sm:$0xff] %v159_v21 }
  0xe0   :  { %237 = shalt.err (!%p234_p9)
}
  0xe1   :  { %170 = dma.vmem_to_hbm [thread:$0]  %s168_s8, 128, %s316_s6, [#allocation6]  }
  0xe2   :  { %248 = dma.done.wait [#allocation6], 128  }
  0xe3   :  { %249 = vsyncadd [#allocation6], 4294967168 }
  0xe4   :  { %174 = vsyncpa [#allocation5], 1 }
  0xe5   :  { %175 = vsyncpa [#allocation6], 1 }

</bundles_post_ra>
